<compile_context>
chip_gen: v5e
topology: v5e:2x2
jax: 0.10.0
libtpu: 0.0.40
codegen_flags: <defaults>
</compile_context>

<pallas_src>
import functools
import math

import jax
import jax.numpy as jnp
from jax import lax
from jax.experimental import pallas as pl
from jax.experimental.pallas import tpu as pltpu

LEAKY_SLOPE = 0.01  # nn.LeakyReLU() default negative_slope
LANE = 128


def _round_up(x, m):
    return (x + m - 1) // m * m


# ----------------------------- Pallas kernel --------------------------------
def _conv_matmul_kernel(x_ref, w_ref, b_ref, o_ref, *, apply_act):
    """One row-tile of a conv lowered to a matmul.

    x_ref: (tm, K_pad)    im2col patches (compute dtype, e.g. bf16)
    w_ref: (K_pad, C_pad) zero-padded weights (compute dtype)
    b_ref: (1, C_pad)     bias, f32
    o_ref: (tm, C_pad)    output tile, f32
    """
    acc = jnp.dot(x_ref[...], w_ref[...], preferred_element_type=jnp.float32)
    acc = acc + b_ref[...]          # f32 bias add (VPU, f32 on all generations)
    if apply_act:
        acc = jnp.where(acc > 0, acc, LEAKY_SLOPE * acc)
    o_ref[...] = acc.astype(o_ref.dtype)


# ----------------------------- layer wrapper --------------------------------
def _im2col(x_nhwc, ksize, stride, pad):
    """(B,H,W,C) -> ((B*Ho*Wo, ksize*ksize*C), Ho, Wo); K order = (ki, kj, c)."""
    if pad:
        x_nhwc = jnp.pad(x_nhwc, ((0, 0), (pad, pad), (pad, pad), (0, 0)))
    B, H, W, C = x_nhwc.shape
    Ho = (H - ksize) // stride + 1
    Wo = (W - ksize) // stride + 1
    taps = []
    for i in range(ksize):
        for j in range(ksize):
            taps.append(
                x_nhwc[:, i:i + stride * Ho:stride, j:j + stride * Wo:stride, :])
    patches = jnp.concatenate(taps, axis=-1)       # (B, Ho, Wo, ksize*ksize*C)
    return patches.reshape(B * Ho * Wo, ksize * ksize * C), Ho, Wo


def _conv_layer(x_nhwc, w, b, *, ksize, stride, pad, apply_act, tm,
                compute_dtype):
    """One Conv2d(+LeakyReLU) layer as im2col + Pallas MXU matmul."""
    B = x_nhwc.shape[0]
    kh, kw, c_in, c_out = w.shape
    assert kh == kw == ksize

    patches, Ho, Wo = _im2col(x_nhwc, ksize, stride, pad)
    N, K = patches.shape

    # Zero-pad K and C_out to lane (128) multiples -> lane-dense loads/stores.
    K_pad = _round_up(K, LANE)
    C_pad = _round_up(c_out, LANE)
    w_mat = jnp.zeros((K_pad, C_pad), dtype=compute_dtype)
    w_mat = w_mat.at[:K, :c_out].set(w.reshape(K, c_out).astype(compute_dtype))
    b_row = jnp.zeros((1, C_pad), dtype=jnp.float32).at[0, :c_out].set(b)

    # Row tiling: big tiles amortize the ~0.35 us per-step overhead; pad rows
    # instead of asserting divisibility so tm can be tuned freely.
    # (For real image sizes on v7x keep >= 2 grid steps so both TCs get work.)
    tm_eff = max(LANE, min(_round_up(tm, LANE), _round_up(N, LANE)))
    N_pad = _round_up(N, tm_eff)
    x_rows = jnp.pad(patches, ((0, N_pad - N), (0, K_pad - K))).astype(compute_dtype)

    grid = (N_pad // tm_eff,)
    out_rows = pl.pallas_call(
        functools.partial(_conv_matmul_kernel, apply_act=apply_act),
        out_shape=jax.ShapeDtypeStruct((N_pad, C_pad), jnp.float32),
        grid_spec=pltpu.PrefetchScalarGridSpec(
            num_scalar_prefetch=0,
            grid=grid,
            in_specs=[
                pl.BlockSpec((tm_eff, K_pad), lambda i: (i, 0)),   # patch tile
                pl.BlockSpec((K_pad, C_pad), lambda i: (0, 0)),    # weights (resident)
                pl.BlockSpec((1, C_pad), lambda i: (0, 0)),        # bias (resident)
            ],
            out_specs=pl.BlockSpec((tm_eff, C_pad), lambda i: (i, 0)),
        ),
        compiler_params=pltpu.CompilerParams(
            dimension_semantics=("parallel",),
            # Budgeted for v7x's 64 MiB/TC; actual use (double-buffered
            # input/output tiles + resident weights) is only a few MiB at
            # tm = 1024..2048.
            vmem_limit_bytes=48 * 1024 * 1024,
        ),
    )(x_rows, w_mat, b_row)

    return out_rows[:N, :c_out].reshape(B, Ho, Wo, c_out)


# ------------------------------- module api ---------------------------------
def init_hyper_encoder(key, dim_in, dim):
    """xavier_normal_(gain=1) conv weights stored (kh, kw, c_in, c_out); bias=0.01."""
    def make_conv(k, c_in, c_out, ksize):
        fan_in = c_in * ksize * ksize
        fan_out = c_out * ksize * ksize
        std = math.sqrt(2.0 / (fan_in + fan_out))
        w = std * jax.random.normal(k, (ksize, ksize, c_in, c_out), dtype=jnp.float32)
        b = jnp.full((c_out,), 0.01, dtype=jnp.float32)
        return w, b

    k1, k2, k3 = jax.random.split(key, 3)
    return (make_conv(k1, dim_in, dim, 3),   # conv1: 3x3, stride 1, pad 0
            make_conv(k2, dim, dim, 5),      # conv2: 5x5, stride 2, pad 1
            make_conv(k3, dim, dim, 5))      # conv3: 5x5, stride 2, pad 0


def hyper_encoder_forward(x_nchw, params, *, tm=1024,
                          compute_dtype=jnp.bfloat16):
    """x_nchw: (B, dim_in, H, W) f32 -> (B, dim, H3, W3) f32 (NCHW, like torch)."""
    (w1, b1), (w2, b2), (w3, b3) = params
    x = jnp.transpose(x_nchw, (0, 2, 3, 1))   # NCHW -> NHWC once
    x = _conv_layer(x, w1, b1, ksize=3, stride=1, pad=0, apply_act=True,
                    tm=tm, compute_dtype=compute_dtype)
    x = _conv_layer(x, w2, b2, ksize=5, stride=2, pad=1, apply_act=True,
                    tm=tm, compute_dtype=compute_dtype)
    x = _conv_layer(x, w3, b3, ksize=5, stride=2, pad=0, apply_act=False,
                    tm=tm, compute_dtype=compute_dtype)
    return jnp.transpose(x, (0, 3, 1, 2))     # NHWC -> NCHW once


# ------------------------------- reference ----------------------------------
def _reference_forward(x_nchw, params):
    """Pure-JAX f32 reference (XLA convolutions), independent of the kernel path."""
    (w1, b1), (w2, b2), (w3, b3) = params

    def conv(x, w, b, stride, pad):
        w_oihw = jnp.transpose(w, (3, 2, 0, 1))
        y = lax.conv_general_dilated(
            x, w_oihw, window_strides=(stride, stride),
            padding=[(pad, pad), (pad, pad)],
            dimension_numbers=("NCHW", "OIHW", "NCHW"))
        return y + b[None, :, None, None]

    h = conv(x_nchw, w1, b1, 1, 0)
    h = jnp.where(h > 0, h, LEAKY_SLOPE * h)
    h = conv(h, w2, b2, 2, 1)
    h = jnp.where(h > 0, h, LEAKY_SLOPE * h)
    return conv(h, w3, b3, 2, 0)


if __name__ == "__main__":
    key = jax.random.PRNGKey(0)
    k_param, k_x = jax.random.split(key)

    dim_in, dim = 4, 4
    B, H, W = 2, 16, 16                      # -> 14x14 -> 6x6 -> 1x1

    params = init_hyper_encoder(k_param, dim_in, dim)
    x = jax.random.normal(k_x, (B, dim_in, H, W), dtype=jnp.float32)

    ref = jax.block_until_ready(_reference_forward(x, params))

    # Semantics check: f32 compute path must match the XLA conv reference tightly.
    out_f32 = jax.block_until_ready(
        hyper_encoder_forward(x, params, compute_dtype=jnp.float32))
    assert out_f32.shape == ref.shape == (B, dim, 1, 1), out_f32.shape
    assert jnp.allclose(out_f32, ref, atol=1e-4, rtol=1e-4), "f32 kernel mismatch"

    # Performance path: bf16 matmul operands, f32 accumulation (looser tolerance).
    out = jax.block_until_ready(
        hyper_encoder_forward(x, params, compute_dtype=jnp.bfloat16))
    assert out.shape == (B, dim, 1, 1), out.shape
    assert bool(jnp.all(jnp.isfinite(out)))
    assert jnp.allclose(out, ref, atol=5e-2, rtol=5e-2), "bf16 kernel drifted"

    print("KERNEL_OK")
</pallas_src>

<mosaic_0001>
module attributes {stable_mosaic.version = 11 : i64} {
  func.func @_conv_matmul_kernel(%arg0: i32, %arg1: memref<512x128xf32, #tpu.memory_space<vmem>>, %arg2: memref<128x128xf32, #tpu.memory_space<vmem>>, %arg3: memref<1x128xf32, #tpu.memory_space<vmem>>, %arg4: memref<512x128xf32, #tpu.memory_space<vmem>>) attributes {dimension_semantics = [#tpu.dimension_semantics<parallel>], iteration_bounds = array<i64: 1>, scalar_prefetch = 0 : i64, scratch_operands = 0 : i64, tpu.core_type = #tpu.core_type<tc>, window_params = [{transform_indices = @transform_0, window_bounds = array<i64: 512, 128>}, {pipeline_mode = #tpu.pipeline_mode<synchronous>, transform_indices = @transform_1, window_bounds = array<i64: 128, 128>}, {pipeline_mode = #tpu.pipeline_mode<synchronous>, transform_indices = @transform_2, window_bounds = array<i64: 1, 128>}, {transform_indices = @transform_3, window_bounds = array<i64: 512, 128>}]} {
    %c0 = arith.constant 0 : index
    %c0_0 = arith.constant 0 : index
    %0 = vector.load %arg1[%c0, %c0_0] : memref<512x128xf32, #tpu.memory_space<vmem>>, vector<512x128xf32>
    %c0_1 = arith.constant 0 : index
    %c0_2 = arith.constant 0 : index
    %1 = vector.load %arg2[%c0_1, %c0_2] : memref<128x128xf32, #tpu.memory_space<vmem>>, vector<128x128xf32>
    %cst = arith.constant dense<0.000000e+00> : vector<512x128xf32>
    %2 = tpu.matmul %0, %1, %cst {dimension_numbers = #tpu.dot_dimension_numbers<[1], [0], [0], [1], [0, 0, 1, 1], [], []>} : vector<512x128xf32>, vector<128x128xf32>, vector<512x128xf32> -> vector<512x128xf32>
    %c0_3 = arith.constant 0 : index
    %c0_4 = arith.constant 0 : index
    %3 = vector.load %arg3[%c0_3, %c0_4] : memref<1x128xf32, #tpu.memory_space<vmem>>, vector<1x128xf32>
    %4 = vector.broadcast %3 : vector<1x128xf32> to vector<512x128xf32>
    %5 = arith.addf %2, %4 : vector<512x128xf32>
    %cst_5 = arith.constant 0.000000e+00 : f32
    %6 = vector.broadcast %cst_5 : f32 to vector<512x128xf32>
    %7 = arith.cmpf ogt, %5, %6 : vector<512x128xf32>
    %cst_6 = arith.constant 0.00999999977 : f32
    %8 = vector.broadcast %cst_6 : f32 to vector<512x128xf32>
    %9 = arith.mulf %8, %5 : vector<512x128xf32>
    %10 = arith.select %7, %5, %9 : vector<512x128xi1>, vector<512x128xf32>
    %c0_7 = arith.constant 0 : index
    %c0_8 = arith.constant 0 : index
    %11 = vector.load %arg4[%c0_7, %c0_8] : memref<512x128xf32, #tpu.memory_space<vmem>>, vector<512x128xf32>
    tpu.vector_store %arg4[%c0_7, %c0_8], %10 {strides = array<i32>} : memref<512x128xf32, #tpu.memory_space<vmem>>, vector<512x128xf32>,
    return
  }
  func.func @transform_0(%arg0: i32) -> (i32, i32) {
    %c0_i32 = arith.constant 0 : i32
    %c0_i32_0 = arith.constant 0 : i32
    return %arg0, %c0_i32 : i32, i32
  }
  func.func @transform_1(%arg0: i32) -> (i32, i32) {
    %c0_i32 = arith.constant 0 : i32
    %c0_i32_0 = arith.constant 0 : i32
    %c0_i32_1 = arith.constant 0 : i32
    return %c0_i32, %c0_i32_0 : i32, i32
  }
  func.func @transform_2(%arg0: i32) -> (i32, i32) {
    %c0_i32 = arith.constant 0 : i32
    %c0_i32_0 = arith.constant 0 : i32
    %c0_i32_1 = arith.constant 0 : i32
    return %c0_i32, %c0_i32_0 : i32, i32
  }
  func.func @transform_3(%arg0: i32) -> (i32, i32) {
    %c0_i32 = arith.constant 0 : i32
    %c0_i32_0 = arith.constant 0 : i32
    return %arg0, %c0_i32 : i32, i32
  }
}

</mosaic_0001>

<bundles_post_ra>
// kernel: tpu_custom_call.1
= control target key start
LH: loop header
LB: loop body
LE: loop exit
PB: predicated region body
PF: predicated region fallthrough
CT: control target
= control target key end

     0   :  { %8 = vsyncpa [#allocation3], 0  ;;  %s860_s0 = inlined_call_operand.hbm [shape: f32[512,128], index: 0, kind: input, shape index: {}]   ;;  %s861_s1 = inlined_call_operand.hbm [shape: f32[128,128], index: 1, kind: input, shape index: {}]   ;;  %s862_s2 = inlined_call_operand.vmem [shape: f32[1,128], index: 2, kind: input, shape index: {}]   ;;  %s863_s3 = inlined_call_operand.hbm [shape: f32[512,128], index: 3, kind: output, shape index: {}]  }
   0x1   :  { %9 = vsyncpa [#allocation6], 0 }
   0x2   :  { %10 = vsyncpa [#allocation4], 0  ;;  %s15_s14 = sshll.u32 %s860_s0, 4  ;;  %s748_s15 = smov [#allocation2]   ;;  %s16_s14 = int_to_ptr.hbm [resolvable:$true] %s15_s14 }
   0x3   :  { %s17_s16 = sshll.u32 %s748_s15, 4  ;;  %s28_s19 = sshll.u32 %s861_s1, 4  ;;  %s18_s16 = int_to_ptr.vmem [resolvable:$true] %s17_s16  ;;  %s29_s19 = int_to_ptr.hbm [resolvable:$true] %s28_s19 }
   0x4   :  { %s749_s20 = smov 128   ;;  %s750_s21 = smov 8  }
   0x5   :  { %23 = dma.hbm_to_vmem [thread:$0]  %s16_s14, 8192, %s18_s16, [#allocation3], %s749_s20, %s749_s20, %s750_s21  }
   0x6   :  { %s751_s22 = smov [#allocation5]  }
   0x7   :  { %s30_s23 = sshll.u32 %s751_s22, 4  ;;  %s31_s23 = int_to_ptr.vmem [resolvable:$true] %s30_s23 }
   0x8   :  { %36 = dma.hbm_to_vmem [thread:$0]  %s29_s19, 2048, %s31_s23, [#allocation6], %s749_s20, %s749_s20, %s750_s21  }
   0x9   :  { %742 = dma.done.wait [#allocation3], 8192  }
   0xa   :  { %743 = vsyncadd [#allocation3], 4294959104 }
   0xb   :  { %744 = dma.done.wait [#allocation6], 2048  }
   0xc   :  { %745 = vsyncadd [#allocation6], 4294965248  ;;  %v126_v0 = vld [vmem:[#allocation5 + $0x78] sm:$0xff]  ;;  %v125_v1 = vld [vmem:[#allocation5 + $0x70] sm:$0xff]  ;;  %s602_s27 = sshll.u32 %s863_s3, 4  ;;  %s603_s27 = int_to_ptr.hbm [resolvable:$true] %s602_s27 }
   0xd   :  { %617 = vmatpush.msra.mxu2 %v126_v0  ;;  %618 = vmatpush.msra.mxu3 %v126_v0  ;;  %v124_v2 = vld [vmem:[#allocation5 + $0x68] sm:$0xff]  ;;  %v123_v3 = vld [vmem:[#allocation5 + $0x60] sm:$0xff]  ;;  %v122_v4 = vld [vmem:[#allocation5 + $0x58] sm:$0xff] }
   0xe   :  { %131 = vmatpush.msra.mxu0 %v126_v0  ;;  %616 = vmatpush.msra.mxu1 %v126_v0  ;;  %v121_v5 = vld [vmem:[#allocation5 + $0x50] sm:$0xff]  ;;  %v120_v6 = vld [vmem:[#allocation5 + $0x48] sm:$0xff]  ;;  %v119_v7 = vld [vmem:[#allocation5 + $0x40] sm:$0xff] }
   0xf   :  { %620 = vmatpush.msra.mxu2 %v125_v1  ;;  %621 = vmatpush.msra.mxu3 %v125_v1  ;;  %v118_v8 = vld [vmem:[#allocation5 + $0x38] sm:$0xff]  ;;  %v117_v9 = vld [vmem:[#allocation5 + $0x30] sm:$0xff]  ;;  %v116_v10 = vld [vmem:[#allocation5 + $0x28] sm:$0xff] }
  0x10   :  { %132 = vmatpush.msra.mxu0 %v125_v1  ;;  %619 = vmatpush.msra.mxu1 %v125_v1  ;;  %v115_v11 = vld [vmem:[#allocation5 + $0x20] sm:$0xff]  ;;  %v114_v12 = vld [vmem:[#allocation5 + $0x18] sm:$0xff]  ;;  %v113_v13 = vld [vmem:[#allocation5 + $0x10] sm:$0xff] }
  0x11   :  { %623 = vmatpush.msra.mxu2 %v124_v2  ;;  %624 = vmatpush.msra.mxu3 %v124_v2  ;;  %v112_v14 = vld [vmem:[#allocation5 + $0x8] sm:$0xff]  ;;  %v111_v15 = vld [vmem:[#allocation5] sm:$0xff]  ;;  %v81_v24 = vld [vmem:[#allocation2 + $0x110] sm:$0xff] }
  0x12   :  { %133 = vmatpush.msra.mxu0 %v124_v2  ;;  %622 = vmatpush.msra.mxu1 %v124_v2  ;;  %v79_v16 = vld [vmem:[#allocation2 + $0x100] sm:$0xff]  ;;  %v80_v20 = vld [vmem:[#allocation2 + $0x108] sm:$0xff]  ;;  %v97_v25 = vld [vmem:[#allocation2 + $0x190] sm:$0xff] }
  0x13   :  { %626 = vmatpush.msra.mxu2 %v123_v3  ;;  %627 = vmatpush.msra.mxu3 %v123_v3  ;;  %v95_v17 = vld [vmem:[#allocation2 + $0x180] sm:$0xff]  ;;  %v96_v21 = vld [vmem:[#allocation2 + $0x188] sm:$0xff]  ;;  %v49_v26 = vld [vmem:[#allocation2 + $0x10] sm:$0xff] }
  0x14   :  { %134 = vmatpush.msra.mxu0 %v123_v3  ;;  %625 = vmatpush.msra.mxu1 %v123_v3  ;;  %v47_v18 = vld [vmem:[#allocation2] sm:$0xff]  ;;  %v48_v22 = vld [vmem:[#allocation2 + $0x8] sm:$0xff]  ;;  %v65_v27 = vld [vmem:[#allocation2 + $0x90] sm:$0xff] }
  0x15   :  { %629 = vmatpush.msra.mxu2 %v122_v4  ;;  %630 = vmatpush.msra.mxu3 %v122_v4  ;;  %v63_v19 = vld [vmem:[#allocation2 + $0x80] sm:$0xff]  ;;  %v64_v23 = vld [vmem:[#allocation2 + $0x88] sm:$0xff]  ;;  %v82_v28 = vld [vmem:[#allocation2 + $0x118] sm:$0xff] }
  0x16   :  { %135 = vmatpush.msra.mxu0 %v122_v4  ;;  %628 = vmatpush.msra.mxu1 %v122_v4  ;;  %v98_v29 = vld [vmem:[#allocation2 + $0x198] sm:$0xff]  ;;  %v83_v32 = vld [vmem:[#allocation2 + $0x120] sm:$0xff]  ;;  %v84_v36 = vld [vmem:[#allocation2 + $0x128] sm:$0xff] }
  0x17   :  { %632 = vmatpush.msra.mxu2 %v121_v5  ;;  %633 = vmatpush.msra.mxu3 %v121_v5  ;;  %v50_v30 = vld [vmem:[#allocation2 + $0x18] sm:$0xff]  ;;  %v99_v33 = vld [vmem:[#allocation2 + $0x1a0] sm:$0xff]  ;;  %v100_v37 = vld [vmem:[#allocation2 + $0x1a8] sm:$0xff] }
  0x18   :  { %136 = vmatpush.msra.mxu0 %v121_v5  ;;  %631 = vmatpush.msra.mxu1 %v121_v5  ;;  %v66_v31 = vld [vmem:[#allocation2 + $0x98] sm:$0xff]  ;;  %v51_v34 = vld [vmem:[#allocation2 + $0x20] sm:$0xff]  ;;  %v52_v38 = vld [vmem:[#allocation2 + $0x28] sm:$0xff] }
  0x19   :  { %635 = vmatpush.msra.mxu2 %v120_v6  ;;  %636 = vmatpush.msra.mxu3 %v120_v6  ;;  %v67_v35 = vld [vmem:[#allocation2 + $0xa0] sm:$0xff]  ;;  %v68_v39 = vld [vmem:[#allocation2 + $0xa8] sm:$0xff]  ;;  %v85_v40 = vld [vmem:[#allocation2 + $0x130] sm:$0xff] }
  0x1a   :  { %137 = vmatpush.msra.mxu0 %v120_v6  ;;  %634 = vmatpush.msra.mxu1 %v120_v6  ;;  %v101_v41 = vld [vmem:[#allocation2 + $0x1b0] sm:$0xff]  ;;  %v86_v44 = vld [vmem:[#allocation2 + $0x138] sm:$0xff]  ;;  %v87_v48 = vld [vmem:[#allocation2 + $0x140] sm:$0xff] }
  0x1b   :  { %638 = vmatpush.msra.mxu2 %v119_v7  ;;  %639 = vmatpush.msra.mxu3 %v119_v7  ;;  %v53_v42 = vld [vmem:[#allocation2 + $0x30] sm:$0xff]  ;;  %v102_v45 = vld [vmem:[#allocation2 + $0x1b8] sm:$0xff]  ;;  %v103_v49 = vld [vmem:[#allocation2 + $0x1c0] sm:$0xff] }
  0x1c   :  { %138 = vmatpush.msra.mxu0 %v119_v7  ;;  %637 = vmatpush.msra.mxu1 %v119_v7  ;;  %v69_v43 = vld [vmem:[#allocation2 + $0xb0] sm:$0xff]  ;;  %v54_v46 = vld [vmem:[#allocation2 + $0x38] sm:$0xff]  ;;  %v55_v50 = vld [vmem:[#allocation2 + $0x40] sm:$0xff] }
  0x1d   :  { %641 = vmatpush.msra.mxu2 %v118_v8  ;;  %642 = vmatpush.msra.mxu3 %v118_v8  ;;  %v70_v47 = vld [vmem:[#allocation2 + $0xb8] sm:$0xff]  ;;  %v71_v51 = vld [vmem:[#allocation2 + $0xc0] sm:$0xff]  ;;  %v88_v52 = vld [vmem:[#allocation2 + $0x148] sm:$0xff] }
  0x1e   :  { %139 = vmatpush.msra.mxu0 %v118_v8  ;;  %640 = vmatpush.msra.mxu1 %v118_v8  ;;  %v104_v53 = vld [vmem:[#allocation2 + $0x1c8] sm:$0xff]  ;;  %v89_v56 = vld [vmem:[#allocation2 + $0x150] sm:$0xff]  ;;  %v90_v60 = vld [vmem:[#allocation2 + $0x158] sm:$0xff] }
  0x1f   :  { %644 = vmatpush.msra.mxu2 %v117_v9  ;;  %645 = vmatpush.msra.mxu3 %v117_v9  ;;  %v56_v54 = vld [vmem:[#allocation2 + $0x48] sm:$0xff]  ;;  %v105_v57 = vld [vmem:[#allocation2 + $0x1d0] sm:$0xff]  ;;  %v106_v61 = vld [vmem:[#allocation2 + $0x1d8] sm:$0xff] }
  0x20   :  { %140 = vmatpush.msra.mxu0 %v117_v9  ;;  %643 = vmatpush.msra.mxu1 %v117_v9  ;;  %v72_v55 = vld [vmem:[#allocation2 + $0xc8] sm:$0xff]  ;;  %v57_v58 = vld [vmem:[#allocation2 + $0x50] sm:$0xff]  ;;  %v58_v62 = vld [vmem:[#allocation2 + $0x58] sm:$0xff] }
  0x21   :  { %647 = vmatpush.msra.mxu2 %v116_v10  ;;  %648 = vmatpush.msra.mxu3 %v116_v10  ;;  %v73_v59 = vld [vmem:[#allocation2 + $0xd0] sm:$0xff]  ;;  %v74_v63 = vld [vmem:[#allocation2 + $0xd8] sm:$0xff]  ;;  %v91_v0 = vld [vmem:[#allocation2 + $0x160] sm:$0xff] }
  0x22   :  { %141 = vmatpush.msra.mxu0 %v116_v10  ;;  %646 = vmatpush.msra.mxu1 %v116_v10  ;;  %v107_v1 = vld [vmem:[#allocation2 + $0x1e0] sm:$0xff]  ;;  %v92_v4 = vld [vmem:[#allocation2 + $0x168] sm:$0xff]  ;;  %v93_v8 = vld [vmem:[#allocation2 + $0x170] sm:$0xff] }
  0x23   :  { %650 = vmatpush.msra.mxu2 %v115_v11  ;;  %651 = vmatpush.msra.mxu3 %v115_v11  ;;  %v59_v2 = vld [vmem:[#allocation2 + $0x60] sm:$0xff]  ;;  %v108_v5 = vld [vmem:[#allocation2 + $0x1e8] sm:$0xff]  ;;  %v109_v9 = vld [vmem:[#allocation2 + $0x1f0] sm:$0xff] }
  0x24   :  { %142 = vmatpush.msra.mxu0 %v115_v11  ;;  %649 = vmatpush.msra.mxu1 %v115_v11  ;;  %v75_v3 = vld [vmem:[#allocation2 + $0xe0] sm:$0xff]  ;;  %v60_v6 = vld [vmem:[#allocation2 + $0x68] sm:$0xff]  ;;  %v61_v10 = vld [vmem:[#allocation2 + $0x70] sm:$0xff] }
  0x25   :  { %653 = vmatpush.msra.mxu2 %v114_v12  ;;  %654 = vmatpush.msra.mxu3 %v114_v12  ;;  %v76_v7 = vld [vmem:[#allocation2 + $0xe8] sm:$0xff]  ;;  %v77_v11 = vld [vmem:[#allocation2 + $0xf0] sm:$0xff] }
  0x26   :  { %143 = vmatpush.msra.mxu0 %v114_v12  ;;  %652 = vmatpush.msra.mxu1 %v114_v12  ;;  %v94_v12 = vld [vmem:[#allocation2 + $0x178] sm:$0xff] }
  0x27   :  { %656 = vmatpush.msra.mxu2 %v113_v13  ;;  %657 = vmatpush.msra.mxu3 %v113_v13 }
  0x28   :  { %144 = vmatpush.msra.mxu0 %v113_v13  ;;  %655 = vmatpush.msra.mxu1 %v113_v13  ;;  %v110_v13 = vld [vmem:[#allocation2 + $0x1f8] sm:$0xff] }
  0x29   :  { %659 = vmatpush.msra.mxu2 %v112_v14  ;;  %660 = vmatpush.msra.mxu3 %v112_v14 }
  0x2a   :  { %145 = vmatpush.msra.mxu0 %v112_v14  ;;  %658 = vmatpush.msra.mxu1 %v112_v14  ;;  %v62_v14 = vld [vmem:[#allocation2 + $0x78] sm:$0xff] }
  0x2b   :  { %662 = vmatpush.msra.mxu2 %v111_v15  ;;  %663 = vmatpush.msra.mxu3 %v111_v15 }
  0x2c   :  { %243 = vmatmul.f32.vlgmr.msra.gmra.mxu2 %v79_v16  ;;  %291 = vmatmul.f32.vlgmr.msra.gmra.mxu3 %v95_v17  ;;  %v788_v16 = vld [vmem:[%s862_s2] ss:$0 sm:$0xff]  ;;  %s752_s2 = smov [#allocation7]  }
  0x2d   :  { %146 = vmatpush.msra.mxu0 %v111_v15  ;;  %661 = vmatpush.msra.mxu1 %v111_v15  ;;  %v78_v15 = vld [vmem:[#allocation2 + $0xf8] sm:$0xff]  ;;  %s600_s24 = sshll.u32 %s752_s2, 4  ;;  %s601_s24 = int_to_ptr.vmem [resolvable:$true] %s600_s24 }
  0x2e   :  { %147 = vmatmul.f32.vlgmr.msra.gmra.mxu0 %v47_v18  ;;  %195 = vmatmul.f32.vlgmr.msra.gmra.mxu1 %v63_v19 }
  0x34   :  { %246 = vmatmul.f32.gmra.mxu2 %v80_v20  ;;  %294 = vmatmul.f32.gmra.mxu3 %v96_v21 }
  0x36   :  { %150 = vmatmul.f32.gmra.mxu0 %v48_v22  ;;  %198 = vmatmul.f32.gmra.mxu1 %v64_v23 }
  0x3c   :  { %249 = vmatmul.f32.gmra.mxu2 %v81_v24  ;;  %297 = vmatmul.f32.gmra.mxu3 %v97_v25 }
  0x3e   :  { %153 = vmatmul.f32.gmra.mxu0 %v49_v26  ;;  %201 = vmatmul.f32.gmra.mxu1 %v65_v27 }
  0x44   :  { %252 = vmatmul.f32.gmra.mxu2 %v82_v28  ;;  %300 = vmatmul.f32.gmra.mxu3 %v98_v29 }
  0x46   :  { %156 = vmatmul.f32.gmra.mxu0 %v50_v30  ;;  %204 = vmatmul.f32.gmra.mxu1 %v66_v31 }
  0x4c   :  { %255 = vmatmul.f32.gmra.mxu2 %v83_v32  ;;  %303 = vmatmul.f32.gmra.mxu3 %v99_v33 }
  0x4e   :  { %159 = vmatmul.f32.gmra.mxu0 %v51_v34  ;;  %207 = vmatmul.f32.gmra.mxu1 %v67_v35 }
  0x54   :  { %258 = vmatmul.f32.gmra.mxu2 %v84_v36  ;;  %306 = vmatmul.f32.gmra.mxu3 %v100_v37 }
  0x56   :  { %162 = vmatmul.f32.gmra.mxu0 %v52_v38  ;;  %210 = vmatmul.f32.gmra.mxu1 %v68_v39 }
  0x5c   :  { %261 = vmatmul.f32.gmra.mxu2 %v85_v40  ;;  %309 = vmatmul.f32.gmra.mxu3 %v101_v41 }
  0x5e   :  { %165 = vmatmul.f32.gmra.mxu0 %v53_v42  ;;  %213 = vmatmul.f32.gmra.mxu1 %v69_v43 }
  0x64   :  { %264 = vmatmul.f32.gmra.mxu2 %v86_v44  ;;  %312 = vmatmul.f32.gmra.mxu3 %v102_v45 }
  0x66   :  { %168 = vmatmul.f32.gmra.mxu0 %v54_v46  ;;  %216 = vmatmul.f32.gmra.mxu1 %v70_v47 }
  0x6c   :  { %267 = vmatmul.f32.gmra.mxu2 %v87_v48  ;;  %315 = vmatmul.f32.gmra.mxu3 %v103_v49 }
  0x6e   :  { %171 = vmatmul.f32.gmra.mxu0 %v55_v50  ;;  %219 = vmatmul.f32.gmra.mxu1 %v71_v51 }
  0x74   :  { %270 = vmatmul.f32.gmra.mxu2 %v88_v52  ;;  %318 = vmatmul.f32.gmra.mxu3 %v104_v53 }
  0x76   :  { %174 = vmatmul.f32.gmra.mxu0 %v56_v54  ;;  %222 = vmatmul.f32.gmra.mxu1 %v72_v55 }
  0x7c   :  { %273 = vmatmul.f32.gmra.mxu2 %v89_v56  ;;  %321 = vmatmul.f32.gmra.mxu3 %v105_v57 }
  0x7e   :  { %177 = vmatmul.f32.gmra.mxu0 %v57_v58  ;;  %225 = vmatmul.f32.gmra.mxu1 %v73_v59 }
  0x84   :  { %276 = vmatmul.f32.gmra.mxu2 %v90_v60  ;;  %324 = vmatmul.f32.gmra.mxu3 %v106_v61 }
  0x86   :  { %180 = vmatmul.f32.gmra.mxu0 %v58_v62  ;;  %228 = vmatmul.f32.gmra.mxu1 %v74_v63 }
  0x8c   :  { %279 = vmatmul.f32.gmra.mxu2 %v91_v0  ;;  %327 = vmatmul.f32.gmra.mxu3 %v107_v1 }
  0x8e   :  { %183 = vmatmul.f32.gmra.mxu0 %v59_v2  ;;  %231 = vmatmul.f32.gmra.mxu1 %v75_v3 }
  0x94   :  { %282 = vmatmul.f32.gmra.mxu2 %v92_v4  ;;  %330 = vmatmul.f32.gmra.mxu3 %v108_v5 }
  0x96   :  { %186 = vmatmul.f32.gmra.mxu0 %v60_v6  ;;  %234 = vmatmul.f32.gmra.mxu1 %v76_v7 }
  0x9c   :  { %285 = vmatmul.f32.gmra.mxu2 %v93_v8  ;;  %333 = vmatmul.f32.gmra.mxu3 %v109_v9 }
  0x9e   :  { %189 = vmatmul.f32.gmra.mxu0 %v61_v10  ;;  %237 = vmatmul.f32.gmra.mxu1 %v77_v11 }
  0xa4   :  { %288 = vmatmul.f32.gmra.mxu2 %v94_v12  ;;  %336 = vmatmul.f32.gmra.mxu3 %v110_v13 }
  0xa6   :  { %192 = vmatmul.f32.gmra.mxu0 %v62_v14  ;;  %240 = vmatmul.f32.gmra.mxu1 %v78_v15 }
  0xab   :  { %v148_v17 = vpop.f32.mrf.mxu0  ;;  %v196_v18 = vpop.f32.mrf.mxu1 }
  0xac   :  { %v149_v19 = vadd.f32 %v788_v16, %v148_v17  ;;  %v197_v20 = vadd.f32 %v788_v16, %v196_v18 }
  0xae   :  { %vm340_vm0 = vcmp.gt.f32.partialorder %v149_v19, 0.0  ;;  %v404_v21 = vmul.f32 0.01, %v149_v19  ;;  %vm356_vm1 = vcmp.gt.f32.partialorder %v197_v20, 0.0  ;;  %v420_v22 = vmul.f32 0.01, %v197_v20 }
  0xaf   :  { %v244_v23 = vpop.f32.mrf.mxu2  ;;  %v292_v24 = vpop.f32.mrf.mxu3 }
  0xb0   :  { %v468_v25 = vsel %vm340_vm0, %v149_v19, %v404_v21  ;;  %v484_v26 = vsel %vm356_vm1, %v197_v20, %v420_v22  ;;  %v245_v27 = vadd.f32 %v788_v16, %v244_v23  ;;  %v293_v28 = vadd.f32 %v788_v16, %v292_v24 }
  0xb1   :  { %532 = vst [vmem:[#allocation7] sm:$0xff] %v468_v25 }
  0xb2   :  { %548 = vst [vmem:[#allocation7 + $0x80] sm:$0xff] %v484_v26  ;;  %vm372_vm2 = vcmp.gt.f32.partialorder %v245_v27, 0.0  ;;  %v436_v29 = vmul.f32 0.01, %v245_v27  ;;  %vm388_vm3 = vcmp.gt.f32.partialorder %v293_v28, 0.0 }
  0xb3   :  { %v452_v30 = vmul.f32 0.01, %v293_v28  ;;  %v151_v31 = vpop.f32.mrf.mxu0  ;;  %v199_v32 = vpop.f32.mrf.mxu1 }
  0xb4   :  { %v500_v33 = vsel %vm372_vm2, %v245_v27, %v436_v29  ;;  %v152_v34 = vadd.f32 %v788_v16, %v151_v31  ;;  %v200_v35 = vadd.f32 %v788_v16, %v199_v32 }
  0xb5   :  { %564 = vst [vmem:[#allocation7 + $0x100] sm:$0xff] %v500_v33  ;;  %v516_v36 = vsel %vm388_vm3, %v293_v28, %v452_v30 }
  0xb6   :  { %580 = vst [vmem:[#allocation7 + $0x180] sm:$0xff] %v516_v36  ;;  %vm341_vm4 = vcmp.gt.f32.partialorder %v152_v34, 0.0  ;;  %v405_v37 = vmul.f32 0.01, %v152_v34  ;;  %vm357_vm5 = vcmp.gt.f32.partialorder %v200_v35, 0.0 }
  0xb7   :  { %v421_v38 = vmul.f32 0.01, %v200_v35  ;;  %v247_v39 = vpop.f32.mrf.mxu2  ;;  %v295_v40 = vpop.f32.mrf.mxu3 }
  0xb8   :  { %v469_v41 = vsel %vm341_vm4, %v152_v34, %v405_v37  ;;  %v248_v42 = vadd.f32 %v788_v16, %v247_v39  ;;  %v296_v43 = vadd.f32 %v788_v16, %v295_v40 }
  0xb9   :  { %533 = vst [vmem:[#allocation7 + $0x8] sm:$0xff] %v469_v41  ;;  %v485_v44 = vsel %vm357_vm5, %v200_v35, %v421_v38 }
  0xba   :  { %549 = vst [vmem:[#allocation7 + $0x88] sm:$0xff] %v485_v44  ;;  %vm373_vm6 = vcmp.gt.f32.partialorder %v248_v42, 0.0  ;;  %v437_v45 = vmul.f32 0.01, %v248_v42  ;;  %vm389_vm7 = vcmp.gt.f32.partialorder %v296_v43, 0.0 }
  0xbb   :  { %v453_v46 = vmul.f32 0.01, %v296_v43  ;;  %v154_v47 = vpop.f32.mrf.mxu0  ;;  %v202_v48 = vpop.f32.mrf.mxu1 }
  0xbc   :  { %v501_v49 = vsel %vm373_vm6, %v248_v42, %v437_v45  ;;  %v155_v50 = vadd.f32 %v788_v16, %v154_v47  ;;  %v203_v51 = vadd.f32 %v788_v16, %v202_v48 }
  0xbd   :  { %565 = vst [vmem:[#allocation7 + $0x108] sm:$0xff] %v501_v49  ;;  %v517_v52 = vsel %vm389_vm7, %v296_v43, %v453_v46 }
  0xbe   :  { %581 = vst [vmem:[#allocation7 + $0x188] sm:$0xff] %v517_v52  ;;  %vm342_vm8 = vcmp.gt.f32.partialorder %v155_v50, 0.0  ;;  %v406_v53 = vmul.f32 0.01, %v155_v50  ;;  %vm358_vm9 = vcmp.gt.f32.partialorder %v203_v51, 0.0 }
  0xbf   :  { %v422_v54 = vmul.f32 0.01, %v203_v51  ;;  %v250_v55 = vpop.f32.mrf.mxu2  ;;  %v298_v56 = vpop.f32.mrf.mxu3 }
  0xc0   :  { %v470_v57 = vsel %vm342_vm8, %v155_v50, %v406_v53  ;;  %v251_v58 = vadd.f32 %v788_v16, %v250_v55  ;;  %v299_v59 = vadd.f32 %v788_v16, %v298_v56 }
  0xc1   :  { %534 = vst [vmem:[#allocation7 + $0x10] sm:$0xff] %v470_v57  ;;  %v486_v60 = vsel %vm358_vm9, %v203_v51, %v422_v54 }
  0xc2   :  { %550 = vst [vmem:[#allocation7 + $0x90] sm:$0xff] %v486_v60  ;;  %vm374_vm10 = vcmp.gt.f32.partialorder %v251_v58, 0.0  ;;  %v438_v61 = vmul.f32 0.01, %v251_v58  ;;  %vm390_vm11 = vcmp.gt.f32.partialorder %v299_v59, 0.0 }
  0xc3   :  { %v454_v62 = vmul.f32 0.01, %v299_v59  ;;  %v157_v63 = vpop.f32.mrf.mxu0  ;;  %v205_v0 = vpop.f32.mrf.mxu1 }
  0xc4   :  { %v502_v1 = vsel %vm374_vm10, %v251_v58, %v438_v61  ;;  %v158_v2 = vadd.f32 %v788_v16, %v157_v63  ;;  %v206_v3 = vadd.f32 %v788_v16, %v205_v0 }
  0xc5   :  { %566 = vst [vmem:[#allocation7 + $0x110] sm:$0xff] %v502_v1  ;;  %v518_v4 = vsel %vm390_vm11, %v299_v59, %v454_v62 }
  0xc6   :  { %582 = vst [vmem:[#allocation7 + $0x190] sm:$0xff] %v518_v4  ;;  %vm343_vm12 = vcmp.gt.f32.partialorder %v158_v2, 0.0  ;;  %v407_v5 = vmul.f32 0.01, %v158_v2  ;;  %vm359_vm13 = vcmp.gt.f32.partialorder %v206_v3, 0.0 }
  0xc7   :  { %v423_v6 = vmul.f32 0.01, %v206_v3  ;;  %v253_v7 = vpop.f32.mrf.mxu2  ;;  %v301_v8 = vpop.f32.mrf.mxu3 }
  0xc8   :  { %v471_v9 = vsel %vm343_vm12, %v158_v2, %v407_v5  ;;  %v254_v10 = vadd.f32 %v788_v16, %v253_v7  ;;  %v302_v11 = vadd.f32 %v788_v16, %v301_v8 }
  0xc9   :  { %535 = vst [vmem:[#allocation7 + $0x18] sm:$0xff] %v471_v9  ;;  %v487_v12 = vsel %vm359_vm13, %v206_v3, %v423_v6 }
  0xca   :  { %551 = vst [vmem:[#allocation7 + $0x98] sm:$0xff] %v487_v12  ;;  %vm375_vm14 = vcmp.gt.f32.partialorder %v254_v10, 0.0  ;;  %v439_v13 = vmul.f32 0.01, %v254_v10  ;;  %vm391_vm15 = vcmp.gt.f32.partialorder %v302_v11, 0.0 }
  0xcb   :  { %v455_v14 = vmul.f32 0.01, %v302_v11  ;;  %v160_v15 = vpop.f32.mrf.mxu0  ;;  %v208_v17 = vpop.f32.mrf.mxu1 }
  0xcc   :  { %v503_v18 = vsel %vm375_vm14, %v254_v10, %v439_v13  ;;  %v161_v19 = vadd.f32 %v788_v16, %v160_v15  ;;  %v209_v20 = vadd.f32 %v788_v16, %v208_v17 }
  0xcd   :  { %567 = vst [vmem:[#allocation7 + $0x118] sm:$0xff] %v503_v18  ;;  %v519_v21 = vsel %vm391_vm15, %v302_v11, %v455_v14 }
  0xce   :  { %583 = vst [vmem:[#allocation7 + $0x198] sm:$0xff] %v519_v21  ;;  %vm344_vm0 = vcmp.gt.f32.partialorder %v161_v19, 0.0  ;;  %v408_v22 = vmul.f32 0.01, %v161_v19  ;;  %vm360_vm1 = vcmp.gt.f32.partialorder %v209_v20, 0.0 }
  0xcf   :  { %v424_v23 = vmul.f32 0.01, %v209_v20  ;;  %v256_v24 = vpop.f32.mrf.mxu2  ;;  %v304_v25 = vpop.f32.mrf.mxu3 }
  0xd0   :  { %v472_v26 = vsel %vm344_vm0, %v161_v19, %v408_v22  ;;  %v257_v27 = vadd.f32 %v788_v16, %v256_v24  ;;  %v305_v28 = vadd.f32 %v788_v16, %v304_v25 }
  0xd1   :  { %536 = vst [vmem:[#allocation7 + $0x20] sm:$0xff] %v472_v26  ;;  %v488_v29 = vsel %vm360_vm1, %v209_v20, %v424_v23 }
  0xd2   :  { %552 = vst [vmem:[#allocation7 + $0xa0] sm:$0xff] %v488_v29  ;;  %vm376_vm2 = vcmp.gt.f32.partialorder %v257_v27, 0.0  ;;  %v440_v30 = vmul.f32 0.01, %v257_v27  ;;  %vm392_vm3 = vcmp.gt.f32.partialorder %v305_v28, 0.0 }
  0xd3   :  { %v456_v31 = vmul.f32 0.01, %v305_v28  ;;  %v163_v32 = vpop.f32.mrf.mxu0  ;;  %v211_v33 = vpop.f32.mrf.mxu1 }
  0xd4   :  { %v504_v34 = vsel %vm376_vm2, %v257_v27, %v440_v30  ;;  %v164_v35 = vadd.f32 %v788_v16, %v163_v32  ;;  %v212_v36 = vadd.f32 %v788_v16, %v211_v33 }
  0xd5   :  { %568 = vst [vmem:[#allocation7 + $0x120] sm:$0xff] %v504_v34  ;;  %v520_v37 = vsel %vm392_vm3, %v305_v28, %v456_v31 }
  0xd6   :  { %584 = vst [vmem:[#allocation7 + $0x1a0] sm:$0xff] %v520_v37  ;;  %vm345_vm4 = vcmp.gt.f32.partialorder %v164_v35, 0.0  ;;  %v409_v38 = vmul.f32 0.01, %v164_v35  ;;  %vm361_vm5 = vcmp.gt.f32.partialorder %v212_v36, 0.0 }
  0xd7   :  { %v425_v39 = vmul.f32 0.01, %v212_v36  ;;  %v259_v40 = vpop.f32.mrf.mxu2  ;;  %v307_v41 = vpop.f32.mrf.mxu3 }
  0xd8   :  { %v473_v42 = vsel %vm345_vm4, %v164_v35, %v409_v38  ;;  %v260_v43 = vadd.f32 %v788_v16, %v259_v40  ;;  %v308_v44 = vadd.f32 %v788_v16, %v307_v41 }
  0xd9   :  { %537 = vst [vmem:[#allocation7 + $0x28] sm:$0xff] %v473_v42  ;;  %v489_v45 = vsel %vm361_vm5, %v212_v36, %v425_v39 }
  0xda   :  { %553 = vst [vmem:[#allocation7 + $0xa8] sm:$0xff] %v489_v45  ;;  %vm377_vm6 = vcmp.gt.f32.partialorder %v260_v43, 0.0  ;;  %v441_v46 = vmul.f32 0.01, %v260_v43  ;;  %vm393_vm7 = vcmp.gt.f32.partialorder %v308_v44, 0.0 }
  0xdb   :  { %v457_v47 = vmul.f32 0.01, %v308_v44  ;;  %v166_v48 = vpop.f32.mrf.mxu0  ;;  %v214_v49 = vpop.f32.mrf.mxu1 }
  0xdc   :  { %v505_v50 = vsel %vm377_vm6, %v260_v43, %v441_v46  ;;  %v167_v51 = vadd.f32 %v788_v16, %v166_v48  ;;  %v215_v52 = vadd.f32 %v788_v16, %v214_v49 }
  0xdd   :  { %569 = vst [vmem:[#allocation7 + $0x128] sm:$0xff] %v505_v50  ;;  %v521_v53 = vsel %vm393_vm7, %v308_v44, %v457_v47 }
  0xde   :  { %585 = vst [vmem:[#allocation7 + $0x1a8] sm:$0xff] %v521_v53  ;;  %vm346_vm8 = vcmp.gt.f32.partialorder %v167_v51, 0.0  ;;  %v410_v54 = vmul.f32 0.01, %v167_v51  ;;  %vm362_vm9 = vcmp.gt.f32.partialorder %v215_v52, 0.0 }
  0xdf   :  { %v426_v55 = vmul.f32 0.01, %v215_v52  ;;  %v262_v56 = vpop.f32.mrf.mxu2  ;;  %v310_v57 = vpop.f32.mrf.mxu3 }
  0xe0   :  { %v474_v58 = vsel %vm346_vm8, %v167_v51, %v410_v54  ;;  %v263_v59 = vadd.f32 %v788_v16, %v262_v56  ;;  %v311_v60 = vadd.f32 %v788_v16, %v310_v57 }
  0xe1   :  { %538 = vst [vmem:[#allocation7 + $0x30] sm:$0xff] %v474_v58  ;;  %v490_v61 = vsel %vm362_vm9, %v215_v52, %v426_v55 }
  0xe2   :  { %554 = vst [vmem:[#allocation7 + $0xb0] sm:$0xff] %v490_v61  ;;  %vm378_vm10 = vcmp.gt.f32.partialorder %v263_v59, 0.0  ;;  %v442_v62 = vmul.f32 0.01, %v263_v59  ;;  %vm394_vm11 = vcmp.gt.f32.partialorder %v311_v60, 0.0 }
  0xe3   :  { %v458_v63 = vmul.f32 0.01, %v311_v60  ;;  %v169_v0 = vpop.f32.mrf.mxu0  ;;  %v217_v1 = vpop.f32.mrf.mxu1 }
  0xe4   :  { %v506_v2 = vsel %vm378_vm10, %v263_v59, %v442_v62  ;;  %v170_v3 = vadd.f32 %v788_v16, %v169_v0  ;;  %v218_v4 = vadd.f32 %v788_v16, %v217_v1 }
  0xe5   :  { %570 = vst [vmem:[#allocation7 + $0x130] sm:$0xff] %v506_v2  ;;  %v522_v5 = vsel %vm394_vm11, %v311_v60, %v458_v63 }
  0xe6   :  { %586 = vst [vmem:[#allocation7 + $0x1b0] sm:$0xff] %v522_v5  ;;  %vm347_vm12 = vcmp.gt.f32.partialorder %v170_v3, 0.0  ;;  %v411_v6 = vmul.f32 0.01, %v170_v3  ;;  %vm363_vm13 = vcmp.gt.f32.partialorder %v218_v4, 0.0 }
  0xe7   :  { %v427_v7 = vmul.f32 0.01, %v218_v4  ;;  %v265_v8 = vpop.f32.mrf.mxu2  ;;  %v313_v9 = vpop.f32.mrf.mxu3 }
  0xe8   :  { %v475_v10 = vsel %vm347_vm12, %v170_v3, %v411_v6  ;;  %v266_v11 = vadd.f32 %v788_v16, %v265_v8  ;;  %v314_v12 = vadd.f32 %v788_v16, %v313_v9 }
  0xe9   :  { %539 = vst [vmem:[#allocation7 + $0x38] sm:$0xff] %v475_v10  ;;  %v491_v13 = vsel %vm363_vm13, %v218_v4, %v427_v7 }
  0xea   :  { %555 = vst [vmem:[#allocation7 + $0xb8] sm:$0xff] %v491_v13  ;;  %vm379_vm14 = vcmp.gt.f32.partialorder %v266_v11, 0.0  ;;  %v443_v14 = vmul.f32 0.01, %v266_v11  ;;  %vm395_vm15 = vcmp.gt.f32.partialorder %v314_v12, 0.0 }
  0xeb   :  { %v459_v15 = vmul.f32 0.01, %v314_v12  ;;  %v172_v17 = vpop.f32.mrf.mxu0  ;;  %v220_v18 = vpop.f32.mrf.mxu1 }
  0xec   :  { %v507_v19 = vsel %vm379_vm14, %v266_v11, %v443_v14  ;;  %v173_v20 = vadd.f32 %v788_v16, %v172_v17  ;;  %v221_v21 = vadd.f32 %v788_v16, %v220_v18 }
  0xed   :  { %571 = vst [vmem:[#allocation7 + $0x138] sm:$0xff] %v507_v19  ;;  %v523_v22 = vsel %vm395_vm15, %v314_v12, %v459_v15 }
  0xee   :  { %587 = vst [vmem:[#allocation7 + $0x1b8] sm:$0xff] %v523_v22  ;;  %vm348_vm0 = vcmp.gt.f32.partialorder %v173_v20, 0.0  ;;  %v412_v23 = vmul.f32 0.01, %v173_v20  ;;  %vm364_vm1 = vcmp.gt.f32.partialorder %v221_v21, 0.0 }
  0xef   :  { %v428_v24 = vmul.f32 0.01, %v221_v21  ;;  %v268_v25 = vpop.f32.mrf.mxu2  ;;  %v316_v26 = vpop.f32.mrf.mxu3 }
  0xf0   :  { %v476_v27 = vsel %vm348_vm0, %v173_v20, %v412_v23  ;;  %v269_v28 = vadd.f32 %v788_v16, %v268_v25  ;;  %v317_v29 = vadd.f32 %v788_v16, %v316_v26 }
  0xf1   :  { %540 = vst [vmem:[#allocation7 + $0x40] sm:$0xff] %v476_v27  ;;  %v492_v30 = vsel %vm364_vm1, %v221_v21, %v428_v24 }
  0xf2   :  { %556 = vst [vmem:[#allocation7 + $0xc0] sm:$0xff] %v492_v30  ;;  %vm380_vm2 = vcmp.gt.f32.partialorder %v269_v28, 0.0  ;;  %v444_v31 = vmul.f32 0.01, %v269_v28  ;;  %vm396_vm3 = vcmp.gt.f32.partialorder %v317_v29, 0.0 }
  0xf3   :  { %v460_v32 = vmul.f32 0.01, %v317_v29  ;;  %v175_v33 = vpop.f32.mrf.mxu0  ;;  %v223_v34 = vpop.f32.mrf.mxu1 }
  0xf4   :  { %v508_v35 = vsel %vm380_vm2, %v269_v28, %v444_v31  ;;  %v176_v36 = vadd.f32 %v788_v16, %v175_v33  ;;  %v224_v37 = vadd.f32 %v788_v16, %v223_v34 }
  0xf5   :  { %572 = vst [vmem:[#allocation7 + $0x140] sm:$0xff] %v508_v35  ;;  %v524_v38 = vsel %vm396_vm3, %v317_v29, %v460_v32 }
  0xf6   :  { %588 = vst [vmem:[#allocation7 + $0x1c0] sm:$0xff] %v524_v38  ;;  %vm349_vm4 = vcmp.gt.f32.partialorder %v176_v36, 0.0  ;;  %v413_v39 = vmul.f32 0.01, %v176_v36  ;;  %vm365_vm5 = vcmp.gt.f32.partialorder %v224_v37, 0.0 }
  0xf7   :  { %v429_v40 = vmul.f32 0.01, %v224_v37  ;;  %v271_v41 = vpop.f32.mrf.mxu2  ;;  %v319_v42 = vpop.f32.mrf.mxu3 }
  0xf8   :  { %v477_v43 = vsel %vm349_vm4, %v176_v36, %v413_v39  ;;  %v272_v44 = vadd.f32 %v788_v16, %v271_v41  ;;  %v320_v45 = vadd.f32 %v788_v16, %v319_v42 }
  0xf9   :  { %541 = vst [vmem:[#allocation7 + $0x48] sm:$0xff] %v477_v43  ;;  %v493_v46 = vsel %vm365_vm5, %v224_v37, %v429_v40 }
  0xfa   :  { %557 = vst [vmem:[#allocation7 + $0xc8] sm:$0xff] %v493_v46  ;;  %vm381_vm6 = vcmp.gt.f32.partialorder %v272_v44, 0.0  ;;  %v445_v47 = vmul.f32 0.01, %v272_v44  ;;  %vm397_vm7 = vcmp.gt.f32.partialorder %v320_v45, 0.0 }
  0xfb   :  { %v461_v48 = vmul.f32 0.01, %v320_v45  ;;  %v178_v49 = vpop.f32.mrf.mxu0  ;;  %v226_v50 = vpop.f32.mrf.mxu1 }
  0xfc   :  { %v509_v51 = vsel %vm381_vm6, %v272_v44, %v445_v47  ;;  %v179_v52 = vadd.f32 %v788_v16, %v178_v49  ;;  %v227_v53 = vadd.f32 %v788_v16, %v226_v50 }
  0xfd   :  { %573 = vst [vmem:[#allocation7 + $0x148] sm:$0xff] %v509_v51  ;;  %v525_v54 = vsel %vm397_vm7, %v320_v45, %v461_v48 }
  0xfe   :  { %589 = vst [vmem:[#allocation7 + $0x1c8] sm:$0xff] %v525_v54  ;;  %vm350_vm8 = vcmp.gt.f32.partialorder %v179_v52, 0.0  ;;  %v414_v55 = vmul.f32 0.01, %v179_v52  ;;  %vm366_vm9 = vcmp.gt.f32.partialorder %v227_v53, 0.0 }
  0xff   :  { %v430_v56 = vmul.f32 0.01, %v227_v53  ;;  %v274_v57 = vpop.f32.mrf.mxu2  ;;  %v322_v58 = vpop.f32.mrf.mxu3 }
 0x100   :  { %v478_v59 = vsel %vm350_vm8, %v179_v52, %v414_v55  ;;  %v275_v60 = vadd.f32 %v788_v16, %v274_v57  ;;  %v323_v61 = vadd.f32 %v788_v16, %v322_v58 }
 0x101   :  { %542 = vst [vmem:[#allocation7 + $0x50] sm:$0xff] %v478_v59  ;;  %v494_v62 = vsel %vm366_vm9, %v227_v53, %v430_v56 }
 0x102   :  { %558 = vst [vmem:[#allocation7 + $0xd0] sm:$0xff] %v494_v62  ;;  %vm382_vm10 = vcmp.gt.f32.partialorder %v275_v60, 0.0  ;;  %v446_v63 = vmul.f32 0.01, %v275_v60  ;;  %vm398_vm11 = vcmp.gt.f32.partialorder %v323_v61, 0.0 }
 0x103   :  { %v462_v0 = vmul.f32 0.01, %v323_v61  ;;  %v181_v1 = vpop.f32.mrf.mxu0  ;;  %v229_v2 = vpop.f32.mrf.mxu1 }
 0x104   :  { %v510_v3 = vsel %vm382_vm10, %v275_v60, %v446_v63  ;;  %v182_v4 = vadd.f32 %v788_v16, %v181_v1  ;;  %v230_v5 = vadd.f32 %v788_v16, %v229_v2 }
 0x105   :  { %574 = vst [vmem:[#allocation7 + $0x150] sm:$0xff] %v510_v3  ;;  %v526_v6 = vsel %vm398_vm11, %v323_v61, %v462_v0 }
 0x106   :  { %590 = vst [vmem:[#allocation7 + $0x1d0] sm:$0xff] %v526_v6  ;;  %vm351_vm12 = vcmp.gt.f32.partialorder %v182_v4, 0.0  ;;  %v415_v7 = vmul.f32 0.01, %v182_v4  ;;  %vm367_vm13 = vcmp.gt.f32.partialorder %v230_v5, 0.0 }
 0x107   :  { %v431_v8 = vmul.f32 0.01, %v230_v5  ;;  %v277_v9 = vpop.f32.mrf.mxu2  ;;  %v325_v10 = vpop.f32.mrf.mxu3 }
 0x108   :  { %v479_v11 = vsel %vm351_vm12, %v182_v4, %v415_v7  ;;  %v278_v12 = vadd.f32 %v788_v16, %v277_v9  ;;  %v326_v13 = vadd.f32 %v788_v16, %v325_v10 }
 0x109   :  { %543 = vst [vmem:[#allocation7 + $0x58] sm:$0xff] %v479_v11  ;;  %v495_v14 = vsel %vm367_vm13, %v230_v5, %v431_v8 }
 0x10a   :  { %559 = vst [vmem:[#allocation7 + $0xd8] sm:$0xff] %v495_v14  ;;  %vm383_vm14 = vcmp.gt.f32.partialorder %v278_v12, 0.0  ;;  %v447_v15 = vmul.f32 0.01, %v278_v12  ;;  %vm399_vm15 = vcmp.gt.f32.partialorder %v326_v13, 0.0 }
 0x10b   :  { %v463_v17 = vmul.f32 0.01, %v326_v13  ;;  %v184_v18 = vpop.f32.mrf.mxu0  ;;  %v232_v19 = vpop.f32.mrf.mxu1 }
 0x10c   :  { %v511_v20 = vsel %vm383_vm14, %v278_v12, %v447_v15  ;;  %v185_v21 = vadd.f32 %v788_v16, %v184_v18  ;;  %v233_v22 = vadd.f32 %v788_v16, %v232_v19 }
 0x10d   :  { %575 = vst [vmem:[#allocation7 + $0x158] sm:$0xff] %v511_v20  ;;  %v527_v23 = vsel %vm399_vm15, %v326_v13, %v463_v17 }
 0x10e   :  { %591 = vst [vmem:[#allocation7 + $0x1d8] sm:$0xff] %v527_v23  ;;  %vm352_vm0 = vcmp.gt.f32.partialorder %v185_v21, 0.0  ;;  %v416_v24 = vmul.f32 0.01, %v185_v21  ;;  %vm368_vm1 = vcmp.gt.f32.partialorder %v233_v22, 0.0 }
 0x10f   :  { %v432_v25 = vmul.f32 0.01, %v233_v22  ;;  %v280_v26 = vpop.f32.mrf.mxu2  ;;  %v328_v27 = vpop.f32.mrf.mxu3 }
 0x110   :  { %v480_v28 = vsel %vm352_vm0, %v185_v21, %v416_v24  ;;  %v281_v29 = vadd.f32 %v788_v16, %v280_v26  ;;  %v329_v30 = vadd.f32 %v788_v16, %v328_v27 }
 0x111   :  { %544 = vst [vmem:[#allocation7 + $0x60] sm:$0xff] %v480_v28  ;;  %v496_v31 = vsel %vm368_vm1, %v233_v22, %v432_v25 }
 0x112   :  { %560 = vst [vmem:[#allocation7 + $0xe0] sm:$0xff] %v496_v31  ;;  %vm384_vm2 = vcmp.gt.f32.partialorder %v281_v29, 0.0  ;;  %v448_v32 = vmul.f32 0.01, %v281_v29  ;;  %vm400_vm3 = vcmp.gt.f32.partialorder %v329_v30, 0.0 }
 0x113   :  { %v464_v33 = vmul.f32 0.01, %v329_v30  ;;  %v187_v34 = vpop.f32.mrf.mxu0  ;;  %v235_v35 = vpop.f32.mrf.mxu1 }
 0x114   :  { %v512_v36 = vsel %vm384_vm2, %v281_v29, %v448_v32  ;;  %v188_v37 = vadd.f32 %v788_v16, %v187_v34  ;;  %v236_v38 = vadd.f32 %v788_v16, %v235_v35 }
 0x115   :  { %576 = vst [vmem:[#allocation7 + $0x160] sm:$0xff] %v512_v36  ;;  %v528_v39 = vsel %vm400_vm3, %v329_v30, %v464_v33 }
 0x116   :  { %592 = vst [vmem:[#allocation7 + $0x1e0] sm:$0xff] %v528_v39  ;;  %vm353_vm4 = vcmp.gt.f32.partialorder %v188_v37, 0.0  ;;  %v417_v40 = vmul.f32 0.01, %v188_v37  ;;  %vm369_vm5 = vcmp.gt.f32.partialorder %v236_v38, 0.0 }
 0x117   :  { %v433_v41 = vmul.f32 0.01, %v236_v38  ;;  %v283_v42 = vpop.f32.mrf.mxu2  ;;  %v331_v43 = vpop.f32.mrf.mxu3 }
 0x118   :  { %v481_v44 = vsel %vm353_vm4, %v188_v37, %v417_v40  ;;  %v284_v45 = vadd.f32 %v788_v16, %v283_v42  ;;  %v332_v46 = vadd.f32 %v788_v16, %v331_v43 }
 0x119   :  { %545 = vst [vmem:[#allocation7 + $0x68] sm:$0xff] %v481_v44  ;;  %v497_v47 = vsel %vm369_vm5, %v236_v38, %v433_v41 }
 0x11a   :  { %561 = vst [vmem:[#allocation7 + $0xe8] sm:$0xff] %v497_v47  ;;  %vm385_vm6 = vcmp.gt.f32.partialorder %v284_v45, 0.0  ;;  %v449_v48 = vmul.f32 0.01, %v284_v45  ;;  %vm401_vm7 = vcmp.gt.f32.partialorder %v332_v46, 0.0 }
 0x11b   :  { %v465_v49 = vmul.f32 0.01, %v332_v46  ;;  %v190_v50 = vpop.f32.mrf.mxu0  ;;  %v238_v51 = vpop.f32.mrf.mxu1 }
 0x11c   :  { %v513_v52 = vsel %vm385_vm6, %v284_v45, %v449_v48  ;;  %v191_v53 = vadd.f32 %v788_v16, %v190_v50  ;;  %v239_v54 = vadd.f32 %v788_v16, %v238_v51 }
 0x11d   :  { %577 = vst [vmem:[#allocation7 + $0x168] sm:$0xff] %v513_v52  ;;  %v529_v55 = vsel %vm401_vm7, %v332_v46, %v465_v49 }
 0x11e   :  { %593 = vst [vmem:[#allocation7 + $0x1e8] sm:$0xff] %v529_v55  ;;  %vm354_vm8 = vcmp.gt.f32.partialorder %v191_v53, 0.0  ;;  %v418_v56 = vmul.f32 0.01, %v191_v53  ;;  %vm370_vm9 = vcmp.gt.f32.partialorder %v239_v54, 0.0 }
 0x11f   :  { %v434_v57 = vmul.f32 0.01, %v239_v54  ;;  %v286_v58 = vpop.f32.mrf.mxu2  ;;  %v334_v59 = vpop.f32.mrf.mxu3 }
 0x120   :  { %v482_v60 = vsel %vm354_vm8, %v191_v53, %v418_v56  ;;  %v287_v61 = vadd.f32 %v788_v16, %v286_v58  ;;  %v335_v62 = vadd.f32 %v788_v16, %v334_v59 }
 0x121   :  { %546 = vst [vmem:[#allocation7 + $0x70] sm:$0xff] %v482_v60  ;;  %v498_v63 = vsel %vm370_vm9, %v239_v54, %v434_v57 }
 0x122   :  { %562 = vst [vmem:[#allocation7 + $0xf0] sm:$0xff] %v498_v63  ;;  %vm386_vm10 = vcmp.gt.f32.partialorder %v287_v61, 0.0  ;;  %v450_v0 = vmul.f32 0.01, %v287_v61  ;;  %vm402_vm11 = vcmp.gt.f32.partialorder %v335_v62, 0.0 }
 0x123   :  { %v466_v1 = vmul.f32 0.01, %v335_v62  ;;  %v193_v2 = vpop.f32.mrf.mxu0  ;;  %v241_v3 = vpop.f32.mrf.mxu1 }
 0x124   :  { %v514_v4 = vsel %vm386_vm10, %v287_v61, %v450_v0  ;;  %v194_v5 = vadd.f32 %v788_v16, %v193_v2  ;;  %v242_v6 = vadd.f32 %v788_v16, %v241_v3 }
 0x125   :  { %578 = vst [vmem:[#allocation7 + $0x170] sm:$0xff] %v514_v4  ;;  %v530_v7 = vsel %vm402_vm11, %v335_v62, %v466_v1 }
 0x126   :  { %594 = vst [vmem:[#allocation7 + $0x1f0] sm:$0xff] %v530_v7  ;;  %vm355_vm12 = vcmp.gt.f32.partialorder %v194_v5, 0.0  ;;  %v419_v8 = vmul.f32 0.01, %v194_v5  ;;  %vm371_vm13 = vcmp.gt.f32.partialorder %v242_v6, 0.0 }
 0x127   :  { %v435_v9 = vmul.f32 0.01, %v242_v6  ;;  %v289_v10 = vpop.f32.mrf.mxu2  ;;  %v337_v11 = vpop.f32.mrf.mxu3 }
 0x128   :  { %v483_v12 = vsel %vm355_vm12, %v194_v5, %v419_v8  ;;  %v290_v13 = vadd.f32 %v788_v16, %v289_v10  ;;  %v338_v14 = vadd.f32 %v788_v16, %v337_v11 }
 0x129   :  { %547 = vst [vmem:[#allocation7 + $0x78] sm:$0xff] %v483_v12  ;;  %v499_v15 = vsel %vm371_vm13, %v242_v6, %v435_v9 }
 0x12a   :  { %563 = vst [vmem:[#allocation7 + $0xf8] sm:$0xff] %v499_v15  ;;  %vm387_vm14 = vcmp.gt.f32.partialorder %v290_v13, 0.0  ;;  %v451_v17 = vmul.f32 0.01, %v290_v13  ;;  %vm403_vm15 = vcmp.gt.f32.partialorder %v338_v14, 0.0 }
 0x12b   :  { %v467_v18 = vmul.f32 0.01, %v338_v14 }
 0x12c   :  { %v515_v19 = vsel %vm387_vm14, %v290_v13, %v451_v17 }
 0x12d   :  { %579 = vst [vmem:[#allocation7 + $0x178] sm:$0xff] %v515_v19  ;;  %v531_v20 = vsel %vm403_vm15, %v338_v14, %v467_v18 }
 0x12e   :  { %595 = vst [vmem:[#allocation7 + $0x1f8] sm:$0xff] %v531_v20 }
 0x12f   :  { %608 = dma.vmem_to_hbm [thread:$0]  %s601_s24, 8192, %s603_s27, [#allocation4], %s749_s20, %s749_s20, %s750_s21  }
 0x130   :  { %746 = dma.done.wait [#allocation4], 8192  }
 0x131   :  { %747 = vsyncadd [#allocation4], 4294959104 }
 0x132   :  { %613 = vsyncpa [#allocation3], 1 }
 0x133   :  { %614 = vsyncpa [#allocation6], 1 }
 0x134   :  { %615 = vsyncpa [#allocation4], 1 }

</bundles_post_ra>
